<compile_context>
chip_gen: v7x
topology: tpu7x:2x2x1
jax: 0.10.0
libtpu: 0.0.40
codegen_flags: <defaults>
</compile_context>

<pallas_src>
import functools

import jax
import jax.numpy as jnp
from jax import lax
from jax.experimental import pallas as pl
from jax.experimental.pallas import tpu as pltpu

ALPHA = 0.5                      # module default weight=0.5
GAMMA = 3                        # module default gamma=3
_OUT_SUB, _OUT_LANE = 8, 128     # lane-dense per-shard partial-sum output block
_VMEM_LIMIT_BYTES = 40 << 20     # raised scoped VMEM (defaults: 16 MiB v5e / 32 MiB v6e,v7x; v7x phys 64 MiB)
_VMEM_BUDGET_BYTES = 30 << 20    # what the tile-size heuristic plans against (leaves headroom under the limit)
_MAX_PREDS_BUFFER_BYTES = 12 << 20


def _round_up(x, m):
    return ((x + m - 1) // m) * m


def _detect_chip():
    """Returns (num_tensorcores_for_this_kernel, looks_like_v7x) with safe fallbacks."""
    cores, is_v7 = 1, False
    try:
        dev = jax.devices()[0]
        kind = str(getattr(dev, "device_kind", "")).lower()
        is_v7 = ("tpu" in kind) and ("7" in kind)
        ncores = getattr(dev, "num_cores", None)
        if isinstance(ncores, int) and ncores > 0:
            cores = ncores
        elif is_v7:
            cores = 2            # v7x: two TensorCores share the grid via 'parallel'
    except Exception:
        pass
    return cores, is_v7


def _default_tile_n(n_classes, itemsize):
    """Largest row tile whose *padded* VMEM footprint fits the planning budget."""
    c_pad = _round_up(max(n_classes, 1), 128)          # lane padding of the preds block
    bytes_per_row = (
        2 * c_pad * itemsize     # preds tile, double-buffered, storage dtype, lane-padded
        + 2 * 8                  # lane-dense targets tile (i32), double-buffered (~4 B/row each)
        + c_pad * 4              # in-flight f32 intermediates (z / exp(z)) for one tile
        + 512                    # worst-case (tile_n,1)-layout temporaries (target relayout, stats, mask)
    )
    rows = _VMEM_BUDGET_BYTES // bytes_per_row
    rows = min(rows, _MAX_PREDS_BUFFER_BYTES // max(c_pad * itemsize, 1))
    return max((rows // 8) * 8, 8)


def _focal_partial_kernel(preds_ref, targets_ref, partial_ref, acc_ref, *,
                          n_rows, tile_n, tiles_per_shard,
                          lane_dense_targets, use_bf16_exp):
    """Accumulates sum_i log p(target_i | logits_i) over this shard's rows."""
    s = pl.program_id(0)           # shard index   ('parallel')
    i = pl.program_id(1)           # row-tile index within shard ('arbitrary')

    @pl.when(i == 0)
    def _init():
        acc_ref[...] = jnp.zeros_like(acc_ref)

    # Load in storage dtype (bf16 stays bf16 through the DMA), widen in-register.
    x = preds_ref[...]                                  # (tile_n, C)
    xf = x.astype(jnp.float32)
    tn, c = xf.shape

    # Targets arrive lane-dense as (8, tile_n//8) (row-major == row-in-tile
    # order); relayout the small int tensor to (tile_n, 1) on the XLU.  The
    # fallback layout already is (tile_n, 1).
    if lane_dense_targets:
        tgt = targets_ref[...].reshape(tn, 1)           # (tile_n, 1) int32
    else:
        tgt = targets_ref[...]                          # (tile_n, 1) int32

    # Numerically stable per-row log-softmax statistics, keepdims -> (tile_n,1).
    # The full (tile_n, C) log-prob tensor is never materialized.
    m = jnp.max(xf, axis=-1, keepdims=True)             # (tile_n, 1)
    if use_bf16_exp:
        # v7x fast path: EUP exp in bf16 (~2x throughput), f32 row sum.
        ez = jnp.exp((xf - m).astype(jnp.bfloat16)).astype(jnp.float32)
    else:
        ez = jnp.exp(xf - m)
    lse = jnp.log(jnp.sum(ez, axis=-1, keepdims=True))  # (tile_n, 1)

    # Picked logit straight from the (widened) input so z = x - m has a single
    # consumer (the exp chain) and stays fused per-vreg.
    col_ids = lax.broadcasted_iota(jnp.int32, (tn, c), 1)
    picked = jnp.sum(jnp.where(col_ids == tgt, xf, 0.0),
                     axis=-1, keepdims=True)             # (tile_n, 1)
    logp = picked - m - lse                              # (tile_n, 1)

    # Mask rows past the true batch size (ragged edge tile / clamped shard tile).
    block_idx = s * tiles_per_shard + i
    row_in_tile = lax.broadcasted_iota(jnp.int32, (tn, 1), 0)
    valid = block_idx * tile_n + row_in_tile < n_rows

    acc_ref[...] += jnp.sum(jnp.where(valid, logp, 0.0), keepdims=True)

    @pl.when(i == tiles_per_shard - 1)
    def _finalize():
        # Broadcast the (1,1) partial sum into a lane-dense (8,128) block
        # (unmasked vst; avoids narrow partial stores).
        partial_ref[...] = jnp.broadcast_to(acc_ref[...], partial_ref.shape)


def _build_call(*, n_rows, n_classes, tiles_total, tile_n, num_shards,
                tiles_per_shard, lane_dense_targets, use_bf16_exp):
    max_block = tiles_total - 1

    def preds_block(s, i):
        # Clamp so a shard whose tile range runs past N re-reads a valid block;
        # the in-kernel row mask zeroes that block's contribution.
        return (jnp.minimum(s * tiles_per_shard + i, max_block), 0)

    if lane_dense_targets:
        tgt_spec = pl.BlockSpec((8, tile_n // 8),
                                lambda s, i: (s * tiles_per_shard + i, 0))
    else:
        tgt_spec = pl.BlockSpec((tile_n, 1), preds_block)

    kernel = functools.partial(
        _focal_partial_kernel, n_rows=n_rows, tile_n=tile_n,
        tiles_per_shard=tiles_per_shard,
        lane_dense_targets=lane_dense_targets, use_bf16_exp=use_bf16_exp)

    return pl.pallas_call(
        kernel,
        out_shape=jax.ShapeDtypeStruct((num_shards * _OUT_SUB, _OUT_LANE),
                                       jnp.float32),
        grid_spec=pltpu.PrefetchScalarGridSpec(
            num_scalar_prefetch=0,
            grid=(num_shards, tiles_per_shard),
            in_specs=[
                pl.BlockSpec((tile_n, n_classes), preds_block),   # preds row tile
                tgt_spec,                                         # targets tile
            ],
            out_specs=pl.BlockSpec((_OUT_SUB, _OUT_LANE), lambda s, i: (s, 0)),
            scratch_shapes=[pltpu.VMEM((1, 1), jnp.float32)],
        ),
        compiler_params=pltpu.CompilerParams(
            dimension_semantics=("parallel", "arbitrary"),
            vmem_limit_bytes=_VMEM_LIMIT_BYTES),
    )


def focal_loss(preds, targets, alpha=ALPHA, gamma=GAMMA, reduction='mean',
               tile_n=None, bf16_exp=None):
    """preds: (N, C) logits (float32 or bfloat16); targets: (N,) int class ids in [0, C)."""
    if reduction not in ('none', 'mean', 'sum'):
        raise NotImplementedError(
            "Invalid reduction mode. Please choose 'none', 'mean', or 'sum'.")

    n_true, c = preds.shape
    targets_flat = targets.reshape(-1).astype(jnp.int32)

    # Tiny-batch guard: keep every block's sublane extent <= the array extent.
    n_arr = n_true
    if n_arr < 8:
        preds = jnp.pad(preds, ((0, 8 - n_arr), (0, 0)))
        n_arr = 8

    itemsize = jnp.dtype(preds.dtype).itemsize
    if tile_n is None:
        tile_n = _default_tile_n(c, itemsize)
    tile_n = max(8, _round_up(int(tile_n), 8))
    tile_n = min(tile_n, (n_arr // 8) * 8)

    num_cores, is_v7 = _detect_chip()
    tiles_total = pl.cdiv(n_arr, tile_n)
    num_shards = max(1, min(num_cores, tiles_total))   # 1 on single-TC v5e/v6e
    tiles_per_shard = pl.cdiv(tiles_total, num_shards)
    total_blocks = num_shards * tiles_per_shard

    if bf16_exp is None:
        bf16_exp = bool(is_v7) and preds.dtype == jnp.bfloat16
    use_bf16_exp = bool(bf16_exp) and preds.dtype == jnp.bfloat16

    # Targets padded to the full block range (cheap: int32, ~4 B/row of HBM).
    pad_to = total_blocks * tile_n
    targets_padded = jnp.pad(targets_flat, (0, pad_to - n_true))

    common = dict(n_rows=n_true, n_classes=c, tiles_total=tiles_total,
                  tile_n=tile_n, num_shards=num_shards,
                  tiles_per_shard=tiles_per_shard, use_bf16_exp=use_bf16_exp)
    try:
        # Preferred: lane-dense targets -> dense DMA, ~16x less targets VMEM.
        partials = _build_call(lane_dense_targets=True, **common)(
            preds, targets_padded.reshape(total_blocks * 8, tile_n // 8))
    except Exception:
        # TODO(synk): drop this fallback once the lane-dense -> column relayout
        # is verified on every Mosaic toolchain; the column layout is the
        # proven (slower-DMA, fatter-VMEM) path.
        partials = _build_call(lane_dense_targets=False, **common)(
            preds, targets_padded.reshape(pad_to, 1))

    # Tiny scalar epilogue: combine per-shard partial sums -> focal loss.
    picked_logp_sum = jnp.sum(partials[::_OUT_SUB, 0])
    ce_mean = -picked_logp_sum * jnp.float32(1.0 / n_true)   # 1/N folded into a constant
    pt = jnp.exp(-ce_mean)
    focal = alpha * (1.0 - pt) ** gamma * ce_mean            # works for int or float gamma
    return focal      # scalar; 'none' / 'mean' / 'sum' all coincide


def focal_loss_ref(preds, targets, alpha=ALPHA, gamma=GAMMA):
    """Pure-JAX reference mirroring F.cross_entropy(reduction='mean') + focal."""
    logp = jax.nn.log_softmax(preds.astype(jnp.float32), axis=-1)
    picked = jnp.take_along_axis(logp, targets[:, None], axis=-1)[:, 0]
    ce = -jnp.mean(picked)
    pt = jnp.exp(-ce)
    return alpha * (1.0 - pt) ** gamma * ce


if __name__ == "__main__":
    key = jax.random.PRNGKey(0)
    k1, k2 = jax.random.split(key)
    N, C = 20, 32          # small shapes; N=20 vs TILE_N=8 exercises the ragged mask
    preds = jax.random.normal(k1, (N, C), dtype=jnp.float32)
    targets = jax.random.randint(k2, (N,), 0, C, dtype=jnp.int32)
    ref = focal_loss_ref(preds, targets)

    # f32, explicit small tile: multi-tile accumulation + clamped/masked edge tile.
    out = jax.block_until_ready(focal_loss(preds, targets, tile_n=8))
    assert jnp.allclose(out, ref, rtol=1e-5, atol=1e-6), (out, ref)

    # f32, default tile heuristic (tile clamped to the small batch).
    out2 = jax.block_until_ready(focal_loss(preds, targets))
    assert jnp.allclose(out2, ref, rtol=1e-5, atol=1e-6), (out2, ref)

    # bf16 storage path: DMA stays bf16, exp dtype auto-selected per chip generation.
    preds_bf16 = preds.astype(jnp.bfloat16)
    ref_bf16 = focal_loss_ref(preds_bf16.astype(jnp.float32), targets)
    out_bf16 = jax.block_until_ready(focal_loss(preds_bf16, targets, tile_n=16))
    assert jnp.allclose(out_bf16, ref_bf16, rtol=5e-3, atol=1e-4), (out_bf16, ref_bf16)

    # Explicitly exercise the bf16-EUP-exp fast path (v7x lever) on any chip.
    out_bf16_fast = jax.block_until_ready(
        focal_loss(preds_bf16, targets, tile_n=8, bf16_exp=True))
    assert jnp.allclose(out_bf16_fast, ref_bf16, rtol=1e-2, atol=1e-3), (out_bf16_fast, ref_bf16)

    print("KERNEL_OK")
</pallas_src>

<mosaic_0001>
module attributes {stable_mosaic.version = 11 : i64} {
  func.func @_focal_partial_kernel(%arg0: i32, %arg1: i32, %arg2: memref<8x32xf32, #tpu.memory_space<vmem>>, %arg3: memref<8x1xi32, #tpu.memory_space<vmem>>, %arg4: memref<8x128xf32, #tpu.memory_space<vmem>>, %arg5: memref<1x1xf32, #tpu.memory_space<vmem>>) attributes {dimension_semantics = [#tpu.dimension_semantics<parallel>, #tpu.dimension_semantics<arbitrary>], iteration_bounds = array<i64: 1, 3>, scalar_prefetch = 0 : i64, scratch_operands = 1 : i64, tpu.core_type = #tpu.core_type<tc>, window_params = [{transform_indices = @transform_0, window_bounds = array<i64: 8, 32>}, {transform_indices = @transform_1, window_bounds = array<i64: 8, 1>}, {transform_indices = @transform_2, window_bounds = array<i64: 8, 128>}]} {
    %c0_i32 = arith.constant 0 : i32
    %0 = arith.cmpi eq, %arg1, %c0_i32 : i32
    %1 = arith.extui %0 : i1 to i32
    %c0_i32_0 = arith.constant 0 : i32
    %2 = arith.cmpi ne, %1, %c0_i32_0 : i32
    scf.if %2 {
      %cst_14 = arith.constant 0.000000e+00 : f32
      %43 = vector.broadcast %cst_14 : f32 to vector<1x1xf32>
      %c0_15 = arith.constant 0 : index
      %c0_16 = arith.constant 0 : index
      %44 = vector.load %arg5[%c0_15, %c0_16] : memref<1x1xf32, #tpu.memory_space<vmem>>, vector<1x1xf32>
      tpu.vector_store %arg5[%c0_15, %c0_16], %43 {strides = array<i32>} : memref<1x1xf32, #tpu.memory_space<vmem>>, vector<1x1xf32>,
    } else {
    }
    %c0 = arith.constant 0 : index
    %c0_1 = arith.constant 0 : index
    %3 = vector.load %arg2[%c0, %c0_1] : memref<8x32xf32, #tpu.memory_space<vmem>>, vector<8x32xf32>
    %c0_2 = arith.constant 0 : index
    %c0_3 = arith.constant 0 : index
    %4 = vector.load %arg3[%c0_2, %c0_3] : memref<8x1xi32, #tpu.memory_space<vmem>>, vector<8x1xi32>
    %cst = arith.constant dense<0xFF800000> : vector<8xf32>
    %5 = vector.multi_reduction <maximumf>, %3, %cst [1] : vector<8x32xf32> to vector<8xf32>
    %6 = vector.shape_cast %5 : vector<8xf32> to vector<8x1xf32>
    %7 = vector.broadcast %6 : vector<8x1xf32> to vector<8x32xf32>
    %8 = arith.subf %3, %7 : vector<8x32xf32>
    %9 = math.exp %8 : vector<8x32xf32>
    %cst_4 = arith.constant dense<0.000000e+00> : vector<8xf32>
    %10 = vector.multi_reduction <add>, %9, %cst_4 [1] : vector<8x32xf32> to vector<8xf32>
    %11 = vector.shape_cast %10 : vector<8xf32> to vector<8x1xf32>
    %12 = math.log %11 : vector<8x1xf32>
    %13 = tpu.iota {dimensions = array<i32: 1>} : vector<8x32xi32>
    %14 = vector.broadcast %4 : vector<8x1xi32> to vector<8x32xi32>
    %15 = arith.cmpi eq, %13, %14 : vector<8x32xi32>
    %cst_5 = arith.constant 0.000000e+00 : f32
    %16 = vector.broadcast %cst_5 : f32 to vector<8x32xf32>
    %17 = arith.select %15, %3, %16 : vector<8x32xi1>, vector<8x32xf32>
    %cst_6 = arith.constant dense<0.000000e+00> : vector<8xf32>
    %18 = vector.multi_reduction <add>, %17, %cst_6 [1] : vector<8x32xf32> to vector<8xf32>
    %19 = vector.shape_cast %18 : vector<8xf32> to vector<8x1xf32>
    %20 = arith.subf %19, %6 : vector<8x1xf32>
    %21 = arith.subf %20, %12 : vector<8x1xf32>
    %c3_i32 = arith.constant 3 : i32
    %22 = arith.muli %arg0, %c3_i32 : i32
    %23 = arith.addi %22, %arg1 : i32
    %24 = tpu.iota {dimensions = array<i32: 0>} : vector<8x1xi32>
    %c8_i32 = arith.constant 8 : i32
    %25 = arith.muli %23, %c8_i32 : i32
    %26 = vector.broadcast %25 : i32 to vector<8x1xi32>
    %27 = arith.addi %26, %24 : vector<8x1xi32>
    %c20_i32 = arith.constant 20 : i32
    %28 = vector.broadcast %c20_i32 : i32 to vector<8x1xi32>
    %29 = arith.cmpi slt, %27, %28 : vector<8x1xi32>
    %c0_7 = arith.constant 0 : index
    %c0_8 = arith.constant 0 : index
    %30 = vector.load %arg5[%c0_7, %c0_8] : memref<1x1xf32, #tpu.memory_space<vmem>>, vector<1x1xf32>
    %cst_9 = arith.constant 0.000000e+00 : f32
    %31 = vector.broadcast %cst_9 : f32 to vector<8x1xf32>
    %32 = arith.select %29, %21, %31 : vector<8x1xi1>, vector<8x1xf32>
    %33 = vector.shape_cast %32 : vector<8x1xf32> to vector<1x8x1xf32>
    %cst_10 = arith.constant dense<0.000000e+00> : vector<1xf32>
    %34 = vector.multi_reduction <add>, %33, %cst_10 [1, 2] : vector<1x8x1xf32> to vector<1xf32>
    %35 = vector.shape_cast %34 : vector<1xf32> to vector<1x1x1xf32>
    %36 = vector.extract %35[0, 0, 0] : f32 from vector<1x1x1xf32>
    %37 = vector.broadcast %36 : f32 to vector<1x1xf32>
    %38 = arith.addf %30, %37 : vector<1x1xf32>
    %c0_11 = arith.constant 0 : index
    %c0_12 = arith.constant 0 : index
    %39 = vector.load %arg5[%c0_11, %c0_12] : memref<1x1xf32, #tpu.memory_space<vmem>>, vector<1x1xf32>
    tpu.vector_store %arg5[%c0_11, %c0_12], %38 {strides = array<i32>} : memref<1x1xf32, #tpu.memory_space<vmem>>, vector<1x1xf32>,
    %c2_i32 = arith.constant 2 : i32
    %40 = arith.cmpi eq, %arg1, %c2_i32 : i32
    %41 = arith.extui %40 : i1 to i32
    %c0_i32_13 = arith.constant 0 : i32
    %42 = arith.cmpi ne, %41, %c0_i32_13 : i32
    scf.if %42 {
      %c0_14 = arith.constant 0 : index
      %c0_15 = arith.constant 0 : index
      %43 = vector.load %arg5[%c0_14, %c0_15] : memref<1x1xf32, #tpu.memory_space<vmem>>, vector<1x1xf32>
      %44 = vector.shape_cast %43 : vector<1x1xf32> to vector<1x1xf32>
      %45 = vector.broadcast %44 : vector<1x1xf32> to vector<8x128xf32>
      %c0_16 = arith.constant 0 : index
      %c0_17 = arith.constant 0 : index
      %46 = vector.load %arg4[%c0_16, %c0_17] : memref<8x128xf32, #tpu.memory_space<vmem>>, vector<8x128xf32>
      tpu.vector_store %arg4[%c0_16, %c0_17], %45 {strides = array<i32>} : memref<8x128xf32, #tpu.memory_space<vmem>>, vector<8x128xf32>,
    } else {
    }
    return
  }
  func.func @transform_0(%arg0: i32, %arg1: i32) -> (i32, i32) {
    %c3_i32 = arith.constant 3 : i32
    %0 = arith.muli %arg0, %c3_i32 : i32
    %1 = arith.addi %0, %arg1 : i32
    %c2_i32 = arith.constant 2 : i32
    %2 = arith.minsi %1, %c2_i32 : i32
    %c0_i32 = arith.constant 0 : i32
    %c0_i32_0 = arith.constant 0 : i32
    return %2, %c0_i32 : i32, i32
  }
  func.func @transform_1(%arg0: i32, %arg1: i32) -> (i32, i32) {
    %c3_i32 = arith.constant 3 : i32
    %0 = arith.muli %arg0, %c3_i32 : i32
    %1 = arith.addi %0, %arg1 : i32
    %c0_i32 = arith.constant 0 : i32
    %c0_i32_0 = arith.constant 0 : i32
    return %1, %c0_i32 : i32, i32
  }
  func.func @transform_2(%arg0: i32, %arg1: i32) -> (i32, i32) {
    %c0_i32 = arith.constant 0 : i32
    %c0_i32_0 = arith.constant 0 : i32
    return %arg0, %c0_i32 : i32, i32
  }
}

module attributes {stable_mosaic.version = 11 : i64} {
  func.func @_focal_partial_kernel(%arg0: i32, %arg1: i32, %arg2: memref<8x32xf32, #tpu.memory_space<vmem>>, %arg3: memref<8x1xi32, #tpu.memory_space<vmem>>, %arg4: memref<8x128xf32, #tpu.memory_space<vmem>>, %arg5: memref<1x1xf32, #tpu.memory_space<vmem>>) attributes {dimension_semantics = [#tpu.dimension_semantics<parallel>, #tpu.dimension_semantics<arbitrary>], iteration_bounds = array<i64: 1, 3>, scalar_prefetch = 0 : i64, scratch_operands = 1 : i64, tpu.core_type = #tpu.core_type<tc>, window_params = [{transform_indices = @transform_0, window_bounds = array<i64: 8, 32>}, {transform_indices = @transform_1, window_bounds = array<i64: 8, 1>}, {transform_indices = @transform_2, window_bounds = array<i64: 8, 128>}]} {
    %c0_i32 = arith.constant 0 : i32
    %0 = arith.cmpi eq, %arg1, %c0_i32 : i32
    %1 = arith.extui %0 : i1 to i32
    %c0_i32_0 = arith.constant 0 : i32
    %2 = arith.cmpi ne, %1, %c0_i32_0 : i32
    scf.if %2 {
      %cst_14 = arith.constant 0.000000e+00 : f32
      %43 = vector.broadcast %cst_14 : f32 to vector<1x1xf32>
      %c0_15 = arith.constant 0 : index
      %c0_16 = arith.constant 0 : index
      %44 = vector.load %arg5[%c0_15, %c0_16] : memref<1x1xf32, #tpu.memory_space<vmem>>, vector<1x1xf32>
      tpu.vector_store %arg5[%c0_15, %c0_16], %43 {strides = array<i32>} : memref<1x1xf32, #tpu.memory_space<vmem>>, vector<1x1xf32>,
    } else {
    }
    %c0 = arith.constant 0 : index
    %c0_1 = arith.constant 0 : index
    %3 = vector.load %arg2[%c0, %c0_1] : memref<8x32xf32, #tpu.memory_space<vmem>>, vector<8x32xf32>
    %c0_2 = arith.constant 0 : index
    %c0_3 = arith.constant 0 : index
    %4 = vector.load %arg3[%c0_2, %c0_3] : memref<8x1xi32, #tpu.memory_space<vmem>>, vector<8x1xi32>
    %cst = arith.constant dense<0xFF800000> : vector<8xf32>
    %5 = vector.multi_reduction <maximumf>, %3, %cst [1] : vector<8x32xf32> to vector<8xf32>
    %6 = vector.shape_cast %5 : vector<8xf32> to vector<8x1xf32>
    %7 = vector.broadcast %6 : vector<8x1xf32> to vector<8x32xf32>
    %8 = arith.subf %3, %7 : vector<8x32xf32>
    %9 = math.exp %8 : vector<8x32xf32>
    %cst_4 = arith.constant dense<0.000000e+00> : vector<8xf32>
    %10 = vector.multi_reduction <add>, %9, %cst_4 [1] : vector<8x32xf32> to vector<8xf32>
    %11 = vector.shape_cast %10 : vector<8xf32> to vector<8x1xf32>
    %12 = math.log %11 : vector<8x1xf32>
    %13 = tpu.iota {dimensions = array<i32: 1>} : vector<8x32xi32>
    %14 = vector.broadcast %4 : vector<8x1xi32> to vector<8x32xi32>
    %15 = arith.cmpi eq, %13, %14 : vector<8x32xi32>
    %cst_5 = arith.constant 0.000000e+00 : f32
    %16 = vector.broadcast %cst_5 : f32 to vector<8x32xf32>
    %17 = arith.select %15, %3, %16 : vector<8x32xi1>, vector<8x32xf32>
    %cst_6 = arith.constant dense<0.000000e+00> : vector<8xf32>
    %18 = vector.multi_reduction <add>, %17, %cst_6 [1] : vector<8x32xf32> to vector<8xf32>
    %19 = vector.shape_cast %18 : vector<8xf32> to vector<8x1xf32>
    %20 = arith.subf %19, %6 : vector<8x1xf32>
    %21 = arith.subf %20, %12 : vector<8x1xf32>
    %c3_i32 = arith.constant 3 : i32
    %22 = arith.muli %arg0, %c3_i32 : i32
    %23 = arith.addi %22, %arg1 : i32
    %24 = tpu.iota {dimensions = array<i32: 0>} : vector<8x1xi32>
    %c8_i32 = arith.constant 8 : i32
    %25 = arith.muli %23, %c8_i32 : i32
    %26 = vector.broadcast %25 : i32 to vector<8x1xi32>
    %27 = arith.addi %26, %24 : vector<8x1xi32>
    %c20_i32 = arith.constant 20 : i32
    %28 = vector.broadcast %c20_i32 : i32 to vector<8x1xi32>
    %29 = arith.cmpi slt, %27, %28 : vector<8x1xi32>
    %c0_7 = arith.constant 0 : index
    %c0_8 = arith.constant 0 : index
    %30 = vector.load %arg5[%c0_7, %c0_8] : memref<1x1xf32, #tpu.memory_space<vmem>>, vector<1x1xf32>
    %cst_9 = arith.constant 0.000000e+00 : f32
    %31 = vector.broadcast %cst_9 : f32 to vector<8x1xf32>
    %32 = arith.select %29, %21, %31 : vector<8x1xi1>, vector<8x1xf32>
    %33 = vector.shape_cast %32 : vector<8x1xf32> to vector<1x8x1xf32>
    %cst_10 = arith.constant dense<0.000000e+00> : vector<1xf32>
    %34 = vector.multi_reduction <add>, %33, %cst_10 [1, 2] : vector<1x8x1xf32> to vector<1xf32>
    %35 = vector.shape_cast %34 : vector<1xf32> to vector<1x1x1xf32>
    %36 = vector.extract %35[0, 0, 0] : f32 from vector<1x1x1xf32>
    %37 = vector.broadcast %36 : f32 to vector<1x1xf32>
    %38 = arith.addf %30, %37 : vector<1x1xf32>
    %c0_11 = arith.constant 0 : index
    %c0_12 = arith.constant 0 : index
    %39 = vector.load %arg5[%c0_11, %c0_12] : memref<1x1xf32, #tpu.memory_space<vmem>>, vector<1x1xf32>
    tpu.vector_store %arg5[%c0_11, %c0_12], %38 {strides = array<i32>} : memref<1x1xf32, #tpu.memory_space<vmem>>, vector<1x1xf32>,
    %c2_i32 = arith.constant 2 : i32
    %40 = arith.cmpi eq, %arg1, %c2_i32 : i32
    %41 = arith.extui %40 : i1 to i32
    %c0_i32_13 = arith.constant 0 : i32
    %42 = arith.cmpi ne, %41, %c0_i32_13 : i32
    scf.if %42 {
      %c0_14 = arith.constant 0 : index
      %c0_15 = arith.constant 0 : index
      %43 = vector.load %arg5[%c0_14, %c0_15] : memref<1x1xf32, #tpu.memory_space<vmem>>, vector<1x1xf32>
      %44 = vector.shape_cast %43 : vector<1x1xf32> to vector<1x1xf32>
      %45 = vector.broadcast %44 : vector<1x1xf32> to vector<8x128xf32>
      %c0_16 = arith.constant 0 : index
      %c0_17 = arith.constant 0 : index
      %46 = vector.load %arg4[%c0_16, %c0_17] : memref<8x128xf32, #tpu.memory_space<vmem>>, vector<8x128xf32>
      tpu.vector_store %arg4[%c0_16, %c0_17], %45 {strides = array<i32>} : memref<8x128xf32, #tpu.memory_space<vmem>>, vector<8x128xf32>,
    } else {
    }
    return
  }
  func.func @transform_0(%arg0: i32, %arg1: i32) -> (i32, i32) {
    %c3_i32 = arith.constant 3 : i32
    %0 = arith.muli %arg0, %c3_i32 : i32
    %1 = arith.addi %0, %arg1 : i32
    %c2_i32 = arith.constant 2 : i32
    %2 = arith.minsi %1, %c2_i32 : i32
    %c0_i32 = arith.constant 0 : i32
    %c0_i32_0 = arith.constant 0 : i32
    return %2, %c0_i32 : i32, i32
  }
  func.func @transform_1(%arg0: i32, %arg1: i32) -> (i32, i32) {
    %c3_i32 = arith.constant 3 : i32
    %0 = arith.muli %arg0, %c3_i32 : i32
    %1 = arith.addi %0, %arg1 : i32
    %c2_i32 = arith.constant 2 : i32
    %2 = arith.minsi %1, %c2_i32 : i32
    %c0_i32 = arith.constant 0 : i32
    %c0_i32_0 = arith.constant 0 : i32
    return %2, %c0_i32 : i32, i32
  }
  func.func @transform_2(%arg0: i32, %arg1: i32) -> (i32, i32) {
    %c0_i32 = arith.constant 0 : i32
    %c0_i32_0 = arith.constant 0 : i32
    return %arg0, %c0_i32 : i32, i32
  }
}

</mosaic_0001>

<bundles_post_ra>
// kernel: tpu_custom_call.1
= control target key start
LH: loop header
LB: loop body
LE: loop exit
PB: predicated region body
PF: predicated region fallthrough
CT: control target
= control target key end

     0   :  { %7 = vsyncpa [#allocation4], 0  ;;  %s478_s9 = smov 0   ;;  %s480_s10 = smov 0   ;;  %s550_s0 = inlined_call_operand.vmem [shape: f32[20,32], index: 0, kind: input, shape index: {}]   ;;  %s551_s1 = inlined_call_operand.vmem [shape: s32[24,1], index: 1, kind: input, shape index: {}]   ;;  %s552_s2 = inlined_call_operand.hbm [shape: f32[8,128], index: 2, kind: output, shape index: {}]  }
   0x1   :  { %s482_s11 = smov 0  }
   0x2 LB: > { %s346_s12 = sadd.s32 4294967295, %s457_s11   ;;  %s22_s13 = sadd.s32 1, %s453_s10  ;;  %s457_s11 = sphi %s482_s11, %s13_s11   ;;  %s453_s10 = sphi %s480_s10, %s555_s10   ;;  %s449_s9 = sphi %s478_s9, %s554_s9  }
   0x3   : > { %p23_p0 = scmp.ge.s32.totalorder %s22_s13, 3  ;;  %p349_p1 = scmp.ge.s32.totalorder %s457_s11, 1 }
   0x4   : > { %p157_p2 = scmp.lt.s32.totalorder %s457_s11, 4 }
   0x5   : > { %s557_s13 = smov (%p23_p0, %s22_s13), 0 }
   0x6   : > { %p158_p3 = pnand %p349_p1, %p157_p2 }
   0x7   : > { %p185_p4 = scmp.lt.s32.totalorder (!%p158_p3), %s449_s9, 2  ;;  %p355_p5 = scmp.ne.s32.totalorder (!%p158_p3), %s449_s9, 0 }
   0x8   : > { %161 = sbr.rel (%p158_p3) target bundleno = 711 (0x2c7), region = 28 }
   0xf   : > { %s186_s14 = scalar_select %p185_p4, %s449_s9, 2 }
  0x10   : > { %206 = sbr.rel (%p355_p5) target bundleno = 23 (0x17), region = 32  ;;  %vm207_vm0 = vcmask (!%p355_p5), 0   ;;  %v459_v0 = vmov (!%p355_p5), 0.0  }
  0x11   : > { %s188_s15 = scalar_select %p185_p4, %s186_s14, 2 }
  0x12   : > { %s354_s16 = sshll.u32 %s186_s14, 3  ;;  %208 = vst.msk [vmem:[#allocation2] sm:$0x1] (!%p355_p5), %vm207_vm0, %v459_v0 }
  0x13   : > { %s353_s17 = sshll.u32 %s188_s15, 3  ;;  %s200_s20 = scalar_lea.vmem %s551_s1, %s354_s16 }
  0x14   : > { %s190_s23 = scalar_lea.vmem %s550_s0, %s353_s17 }
  0x17 PF: > { %v209_v1 = vld [vmem:[%s190_s23] sm:$0xff]  ;;  %vm211_vm1 = vcmask 261120   ;;  %v460_v3 = vmov 0   ;;  %v223_v8 = vlaneseq  ;;  %s356_s24 = sshll.u32 %s449_s9, 3  ;;  %vm245_vm4 = vcmask 7168   ;;  %p357_p6 = scmp.ne.s32.totalorder %s449_s9, 2 }
  0x18   : > { %v212_v2 = vsel %vm211_vm1, %v209_v1, -inf  ;;  %399 = vset.pattern.permute.xlu0 %v460_v3  ;;  %v210_v4 = vld [vmem:[%s200_s20] sm:$0xff]  ;;  %v240_v17 = vstv %s356_s24  ;;  %vm258_vm5 = vcmask 0   ;;  %v461_v37 = vmov (!%p357_p6), 0  }
  0x19   : > { %213 = vmax.xlane.f32.xlu0 %v212_v2  ;;  %v224_v9 = vand.u32 127, %v223_v8  ;;  %v238_v16 = vshrl.u32 %v223_v8, 7  ;;  %v243_v33 = vld [vmem:[#allocation2] sm:$0x1] }
  0x1b   : > { %v241_v19 = vadd.s32 %v240_v17, %v238_v16 }
  0x1d   : > { %vm242_vm3 = vcmp.lt.s32.totalorder %v241_v19, 20 }
  0x2f   : > { %226 = vperm.xlu0 %399, %v210_v4  }
  0x33   : > { %404 = vset.pattern.permute.xlu0 (!%p357_p6), %v461_v37 }
  0xa6   : > { %v214_v5 = vpop.xlane.xlu0 %213 }
  0xa7   : > { %v215_v6 = vsub.f32 %v209_v1, %v214_v5 }
  0xa9   : > { %v216_v7 = vmul.f32 1.442695, %v215_v6 }
  0xab   : > { %400 = vpow2.f32 %v216_v7 }
  0xae   : > { %v227_v10 = vpop.permute.xlu0 %226 }
  0xaf   : > { %vm228_vm2 = vcmp.eq.s32.totalorder %v224_v9, %v227_v10 }
  0xb0   : > { %v229_v12 = vsel %vm228_vm2, %v209_v1, 0.0 }
  0xb1   : > { %v230_v14 = vsel %vm211_vm1, %v229_v12, 0.0 }
  0xb5   : > { %v401_v11 = vpop.eup %400 }
  0xb6   : > { %v218_v13 = vsel %vm211_vm1, %v401_v11, 0.0 }
  0xb7   : > { %219 = vadd.xlane.f32.xlu1 %v218_v13 }
  0xbb   : > { %231 = vadd.xlane.f32.xlu1 %v230_v14 }
 0x144   : > { %v220_v15 = vpop.xlane.xlu1 %219 }
 0x145   : > { %402 = vlog2.f32 %v220_v15 }
 0x148   : > { %v232_v18 = vpop.xlane.xlu1 %231 }
 0x149   : > { %v233_v22 = vsub.f32 %v232_v18, %v214_v5 }
 0x14f   : > { %v403_v20 = vpop.eup %402 }
 0x150   : > { %v222_v21 = vmul.f32 0.6931472, %v403_v20 }
 0x152   : > { %v234_v23 = vsub.f32 %v233_v22, %v222_v21 }
 0x154   : > { %v244_v24 = vsel %vm242_vm3, %v234_v23, 0.0 }
 0x155   : > { %v246_v25 = vsel %vm245_vm4, %v244_v24, 0.0 }
 0x156   : > { %247 = vadd.xlane.f32.xlu1 %v246_v25 }
 0x1e3   : > { %v248_v26 = vpop.xlane.xlu1 %247 }
 0x1e4   : > { %v249_v27 = vrot.slane %v248_v26, 4 }
 0x1e6   : > { %v250_v28 = vadd.f32 %v249_v27, %v248_v26 }
 0x1e8   : > { %v251_v29 = vrot.slane %v250_v28, 2 }
 0x1ea   : > { %v252_v30 = vadd.f32 %v251_v29, %v250_v28 }
 0x1ec   : > { %v253_v31 = vrot.slane %v252_v30, 1 }
 0x1ee   : > { %v254_v32 = vadd.f32 %v253_v31, %v252_v30 }
 0x1f0   : > { %363 = vpush %v254_v32 }
 0x21f   : > { %263 = sbr.rel (%p357_p6) target bundleno = 686 (0x2ae), region = 36 }
 0x221   : > { %s364_s25 = spop %363 }
 0x222   : > { %v256_v34 = vstv %s364_s25 }
 0x223   : > { %v257_v35 = vadd.f32 %v256_v34, %v243_v33 }
 0x225   : > { %259 = vst.msk [vmem:[#allocation2] sm:$0x1] %vm258_vm5, %v257_v35 }
 0x22c   : > { %v358_v36 = vld [vmem:[#allocation2] ss:$0 sm:$0xff] }
 0x22d   : > { %271 = vperm.xlu0 %404, %v358_v36  }
 0x2ac   : > { %v272_v38 = vpop.permute.xlu0 %271 }
 0x2ad   : > { %274 = vst [vmem:[#allocation3] sm:$0xff] %v272_v38 }
 0x2ae PF: > { %p515_p7 = scmp.eq.s32.totalorder %s346_s12, 2  ;;  %s462_s27 = smov [#allocation3]  }
 0x2af   : > { %s284_s28 = sshll.u32 %s462_s27, 4  ;;  %s285_s28 = int_to_ptr.vmem [resolvable:$true] %s284_s28 }
 0x2b0   : > { %s405_s29 = scalar_lea.vmem %s285_s28, 128  ;;  %p412_p11 = scmp.lt.s32.totalorder %s285_s28, %s285_s28 }
 0x2b1   : > { %p406_p8 = scmp.ne.s32.totalorder %s285_s28, %s405_s29  ;;  %p413_p12 = scmp.lt.s32.totalorder %s405_s29, %s405_s29 }
 0x2b3   : > { %p407_p9 = pnand %p406_p8, %p515_p7  ;;  %p414_p13 = por %p413_p12, %p412_p11 }
 0x2b5   : > { %p408_p10 = pneg %p407_p9 }
 0x2b7   : > { %p415_p0 = pnand %p414_p13, %p408_p10 }
 0x2b9   : > { %418 = shalt.err (!%p415_p0)
}
 0x2ba   : > { %s419_s4 = scalar_lea.hbm %s552_s2, 128 }
 0x2bb   : > { %p420_p1 = scmp.ne.s32.totalorder %s552_s2, %s419_s4  ;;  %p425_p4 = scmp.lt.u32.totalorder %s419_s4, %s552_s2 }
 0x2bd   : > { %p421_p2 = pnand %p420_p1, %p515_p7 }
 0x2bf   : > { %p422_p3 = pneg %p421_p2 }
 0x2c1   : > { %p427_p5 = pnand %p425_p4, %p422_p3 }
 0x2c3   : > { %430 = shalt.err (!%p427_p5)
}
 0x2c4   : > { %366 = dma.vmem_to_hbm [thread:$0]  (%p515_p7), %s285_s28, 128, %s552_s2, [#allocation4]  }
 0x2c5   : > { %444 = dma.done.wait (%p515_p7), [#allocation4], 128  }
 0x2c6   : > { %446 = vsyncadd (%p515_p7), [#allocation4], 4294967168 }
 0x2c7 PF: > { %s13_s11 = sadd.s32 1, %s457_s11   ;;  %s554_s9 = smov %s453_s10 }
 0x2c8   : > { %p10_p6 = scmp.ge.s32.totalorder %s13_s11, 5   ;;  %s555_s10 = smov %s557_s13 }
 0x2ca   :  { %12 = sbr.rel (!%p10_p6) target bundleno = 2 (0x2), region = 67 }
 0x2d1   :  { %297 = vsyncpa [#allocation4], 1 }
 0x2d2   :  { %299 = vsyncpa [#allocation4 + $0x1], 1 }

// kernel: tpu_custom_call.1
= control target key start
LH: loop header
LB: loop body
LE: loop exit
PB: predicated region body
PF: predicated region fallthrough
CT: control target
= control target key end

     0   :  { %7 = vsyncpa [#allocation4], 0  ;;  %s495_s9 = smov 0   ;;  %s497_s10 = smov 0   ;;  %s567_s0 = inlined_call_operand.vmem [shape: f32[20,32], index: 0, kind: input, shape index: {}]   ;;  %s568_s1 = inlined_call_operand.vmem [shape: s32[24,1], index: 1, kind: input, shape index: {}]   ;;  %s569_s2 = inlined_call_operand.hbm [shape: f32[8,128], index: 2, kind: output, shape index: {}]  }
   0x1   :  { %s499_s11 = smov 0  }
   0x2 LB: > { %s360_s12 = sadd.s32 4294967295, %s474_s11   ;;  %s22_s13 = sadd.s32 1, %s470_s10  ;;  %s474_s11 = sphi %s499_s11, %s13_s11   ;;  %s470_s10 = sphi %s497_s10, %s572_s10   ;;  %s466_s9 = sphi %s495_s9, %s571_s9  }
   0x3   : > { %p23_p0 = scmp.ge.s32.totalorder %s22_s13, 3  ;;  %p363_p1 = scmp.ge.s32.totalorder %s474_s11, 1 }
   0x4   : > { %p165_p2 = scmp.lt.s32.totalorder %s474_s11, 4 }
   0x5   : > { %s574_s13 = smov (%p23_p0, %s22_s13), 0 }
   0x6   : > { %p166_p3 = pnand %p363_p1, %p165_p2 }
   0x7   : > { %p195_p4 = scmp.lt.s32.totalorder (!%p166_p3), %s466_s9, 2  ;;  %p372_p5 = scmp.ne.s32.totalorder (!%p166_p3), %s466_s9, 0 }
   0x8   : > { %169 = sbr.rel (%p166_p3) target bundleno = 711 (0x2c7), region = 28 }
   0xf   : > { %s196_s14 = scalar_select %p195_p4, %s466_s9, 2 }
  0x10   : > { %220 = sbr.rel (%p372_p5) target bundleno = 23 (0x17), region = 32  ;;  %vm221_vm0 = vcmask (!%p372_p5), 0   ;;  %v476_v0 = vmov (!%p372_p5), 0.0  }
  0x11   : > { %s576_s14 = smov (!%p195_p4, %s196_s14), 2  ;;  %222 = vst.msk [vmem:[#allocation2] sm:$0x1] (!%p372_p5), %vm221_vm0, %v476_v0 }
  0x12   : > { %s367_s15 = sshll.u32 %s576_s14, 3 }
  0x13   : > { %s200_s18 = scalar_lea.vmem %s567_s0, %s367_s15  ;;  %s212_s21 = scalar_lea.vmem %s568_s1, %s367_s15 }
  0x17 PF: > { %v223_v1 = vld [vmem:[%s200_s18] sm:$0xff]  ;;  %vm225_vm1 = vcmask 261120   ;;  %v477_v3 = vmov 0   ;;  %v237_v8 = vlaneseq  ;;  %s373_s22 = sshll.u32 %s466_s9, 3  ;;  %vm259_vm4 = vcmask 7168   ;;  %p374_p6 = scmp.ne.s32.totalorder %s466_s9, 2 }
  0x18   : > { %v226_v2 = vsel %vm225_vm1, %v223_v1, -inf  ;;  %416 = vset.pattern.permute.xlu0 %v477_v3  ;;  %v224_v4 = vld [vmem:[%s212_s21] sm:$0xff]  ;;  %v254_v17 = vstv %s373_s22  ;;  %vm272_vm5 = vcmask 0   ;;  %v478_v37 = vmov (!%p374_p6), 0  }
  0x19   : > { %227 = vmax.xlane.f32.xlu0 %v226_v2  ;;  %v238_v9 = vand.u32 127, %v237_v8  ;;  %v252_v16 = vshrl.u32 %v237_v8, 7  ;;  %v257_v33 = vld [vmem:[#allocation2] sm:$0x1] }
  0x1b   : > { %v255_v19 = vadd.s32 %v254_v17, %v252_v16 }
  0x1d   : > { %vm256_vm3 = vcmp.lt.s32.totalorder %v255_v19, 20 }
  0x2f   : > { %240 = vperm.xlu0 %416, %v224_v4  }
  0x33   : > { %421 = vset.pattern.permute.xlu0 (!%p374_p6), %v478_v37 }
  0xa6   : > { %v228_v5 = vpop.xlane.xlu0 %227 }
  0xa7   : > { %v229_v6 = vsub.f32 %v223_v1, %v228_v5 }
  0xa9   : > { %v230_v7 = vmul.f32 1.442695, %v229_v6 }
  0xab   : > { %417 = vpow2.f32 %v230_v7 }
  0xae   : > { %v241_v10 = vpop.permute.xlu0 %240 }
  0xaf   : > { %vm242_vm2 = vcmp.eq.s32.totalorder %v238_v9, %v241_v10 }
  0xb0   : > { %v243_v12 = vsel %vm242_vm2, %v223_v1, 0.0 }
  0xb1   : > { %v244_v14 = vsel %vm225_vm1, %v243_v12, 0.0 }
  0xb5   : > { %v418_v11 = vpop.eup %417 }
  0xb6   : > { %v232_v13 = vsel %vm225_vm1, %v418_v11, 0.0 }
  0xb7   : > { %233 = vadd.xlane.f32.xlu1 %v232_v13 }
  0xbb   : > { %245 = vadd.xlane.f32.xlu1 %v244_v14 }
 0x144   : > { %v234_v15 = vpop.xlane.xlu1 %233 }
 0x145   : > { %419 = vlog2.f32 %v234_v15 }
 0x148   : > { %v246_v18 = vpop.xlane.xlu1 %245 }
 0x149   : > { %v247_v22 = vsub.f32 %v246_v18, %v228_v5 }
 0x14f   : > { %v420_v20 = vpop.eup %419 }
 0x150   : > { %v236_v21 = vmul.f32 0.6931472, %v420_v20 }
 0x152   : > { %v248_v23 = vsub.f32 %v247_v22, %v236_v21 }
 0x154   : > { %v258_v24 = vsel %vm256_vm3, %v248_v23, 0.0 }
 0x155   : > { %v260_v25 = vsel %vm259_vm4, %v258_v24, 0.0 }
 0x156   : > { %261 = vadd.xlane.f32.xlu1 %v260_v25 }
 0x1e3   : > { %v262_v26 = vpop.xlane.xlu1 %261 }
 0x1e4   : > { %v263_v27 = vrot.slane %v262_v26, 4 }
 0x1e6   : > { %v264_v28 = vadd.f32 %v263_v27, %v262_v26 }
 0x1e8   : > { %v265_v29 = vrot.slane %v264_v28, 2 }
 0x1ea   : > { %v266_v30 = vadd.f32 %v265_v29, %v264_v28 }
 0x1ec   : > { %v267_v31 = vrot.slane %v266_v30, 1 }
 0x1ee   : > { %v268_v32 = vadd.f32 %v267_v31, %v266_v30 }
 0x1f0   : > { %380 = vpush %v268_v32 }
 0x21f   : > { %277 = sbr.rel (%p374_p6) target bundleno = 686 (0x2ae), region = 36 }
 0x221   : > { %s381_s23 = spop %380 }
 0x222   : > { %v270_v34 = vstv %s381_s23 }
 0x223   : > { %v271_v35 = vadd.f32 %v270_v34, %v257_v33 }
 0x225   : > { %273 = vst.msk [vmem:[#allocation2] sm:$0x1] %vm272_vm5, %v271_v35 }
 0x22c   : > { %v375_v36 = vld [vmem:[#allocation2] ss:$0 sm:$0xff] }
 0x22d   : > { %285 = vperm.xlu0 %421, %v375_v36  }
 0x2ac   : > { %v286_v38 = vpop.permute.xlu0 %285 }
 0x2ad   : > { %288 = vst [vmem:[#allocation3] sm:$0xff] %v286_v38 }
 0x2ae PF: > { %p532_p7 = scmp.eq.s32.totalorder %s360_s12, 2  ;;  %s479_s25 = smov [#allocation3]  }
 0x2af   : > { %s298_s26 = sshll.u32 %s479_s25, 4  ;;  %s299_s26 = int_to_ptr.vmem [resolvable:$true] %s298_s26 }
 0x2b0   : > { %s422_s27 = scalar_lea.vmem %s299_s26, 128  ;;  %p429_p11 = scmp.lt.s32.totalorder %s299_s26, %s299_s26 }
 0x2b1   : > { %p423_p8 = scmp.ne.s32.totalorder %s299_s26, %s422_s27  ;;  %p430_p12 = scmp.lt.s32.totalorder %s422_s27, %s422_s27 }
 0x2b3   : > { %p424_p9 = pnand %p423_p8, %p532_p7  ;;  %p431_p13 = por %p430_p12, %p429_p11 }
 0x2b5   : > { %p425_p10 = pneg %p424_p9 }
 0x2b7   : > { %p432_p0 = pnand %p431_p13, %p425_p10 }
 0x2b9   : > { %435 = shalt.err (!%p432_p0)
}
 0x2ba   : > { %s436_s30 = scalar_lea.hbm %s569_s2, 128 }
 0x2bb   : > { %p437_p1 = scmp.ne.s32.totalorder %s569_s2, %s436_s30  ;;  %p442_p4 = scmp.lt.u32.totalorder %s436_s30, %s569_s2 }
 0x2bd   : > { %p438_p2 = pnand %p437_p1, %p532_p7 }
 0x2bf   : > { %p439_p3 = pneg %p438_p2 }
 0x2c1   : > { %p444_p5 = pnand %p442_p4, %p439_p3 }
 0x2c3   : > { %447 = shalt.err (!%p444_p5)
}
 0x2c4   : > { %383 = dma.vmem_to_hbm [thread:$0]  (%p532_p7), %s299_s26, 128, %s569_s2, [#allocation4]  }
 0x2c5   : > { %461 = dma.done.wait (%p532_p7), [#allocation4], 128  }
 0x2c6   : > { %463 = vsyncadd (%p532_p7), [#allocation4], 4294967168 }
 0x2c7 PF: > { %s13_s11 = sadd.s32 1, %s474_s11   ;;  %s571_s9 = smov %s470_s10 }
 0x2c8   : > { %p10_p6 = scmp.ge.s32.totalorder %s13_s11, 5   ;;  %s572_s10 = smov %s574_s13 }
 0x2ca   :  { %12 = sbr.rel (!%p10_p6) target bundleno = 2 (0x2), region = 67 }
 0x2d1   :  { %311 = vsyncpa [#allocation4], 1 }
 0x2d2   :  { %313 = vsyncpa [#allocation4 + $0x1], 1 }

</bundles_post_ra>
